<compile_context>
chip_gen: v5e
topology: v5e:2x2
jax: 0.10.0
libtpu: 0.0.40
codegen_flags: <defaults>
</compile_context>

<pallas_src>
import math
from functools import partial

import jax
import jax.numpy as jnp
from jax.experimental import pallas as pl
from jax.experimental.pallas import tpu as pltpu

NEG_INF = -1e9


def _mha_kernel(mb_ref, xq_ref, xk_ref, xv_ref,
                wq_ref, bq_ref, wk_ref, bk_ref, wv_ref, bv_ref,
                wo_ref, bo_ref,
                o_ref,
                k_scr, v_scr, ctx_scr,
                *, num_heads, d_k, scale):
    qi = pl.program_id(1)

    # ---- K/V projections: once per batch element, kept resident in VMEM ----
    @pl.when(qi == 0)
    def _():
        k = jnp.dot(xk_ref[0], wk_ref[...],
                    preferred_element_type=jnp.float32) + bk_ref[...]
        v = jnp.dot(xv_ref[0], wv_ref[...],
                    preferred_element_type=jnp.float32) + bv_ref[...]
        k_scr[...] = k.astype(k_scr.dtype)
        v_scr[...] = v.astype(v_scr.dtype)

    # ---- Q projection for this query tile (bf16 operands, f32 accumulate) --
    q = jnp.dot(xq_ref[0], wq_ref[...],
                preferred_element_type=jnp.float32) + bq_ref[...]
    q = (q * jnp.float32(scale)).astype(jnp.bfloat16)      # fold 1/sqrt(d_k)

    # Additive mask bias, broadcast once (hoisted out of the head loop).
    mbias = mb_ref[0]                                        # (Mq, Sk) f32
    if mbias.shape[0] != q.shape[0]:
        mbias = jnp.broadcast_to(mbias, (q.shape[0], mbias.shape[1]))

    # ---- Per-head attention (unrolled); results go into a full-D ctx slab --
    for h in range(num_heads):
        lo = h * d_k
        q_h = q[:, lo:lo + d_k]                              # (tq, d_k) bf16
        k_h = k_scr[:, lo:lo + d_k]                          # (Sk, d_k) bf16
        v_h = v_scr[:, lo:lo + d_k]                          # (Sk, d_k) bf16

        # scores = q_h @ k_h^T (contract d_k; no explicit transpose).
        s = jax.lax.dot_general(q_h, k_h, (((1,), (1,)), ((), ())),
                                preferred_element_type=jnp.float32)
        s = s + mbias                                        # masked -> -1e9

        # Numerically-stable softmax in f32; reciprocal on the EUP slot.
        m = jnp.max(s, axis=-1, keepdims=True)
        p = jnp.exp(s - m)
        denom = jnp.sum(p, axis=-1, keepdims=True)
        p = p * pl.reciprocal(denom, approx=True)
        # TODO(synk): attention dropout (p=0.1) is identity in eval mode and
        # torch's RNG stream cannot be reproduced in-kernel, so it is omitted.

        ctx_scr[:, lo:lo + d_k] = jnp.dot(
            p.astype(jnp.bfloat16), v_h, preferred_element_type=jnp.float32)

    # ---- Output projection: one full-depth (D) MXU contraction -------------
    out = jnp.dot(ctx_scr[...].astype(jnp.bfloat16), wo_ref[...],
                  preferred_element_type=jnp.float32) + bo_ref[...]
    o_ref[0] = out.astype(o_ref.dtype)


def _choose_tq(sq):
    """Query-tile size: keep VMEM bounded, respect (8,128)/full-dim rule."""
    if sq <= 256:
        return sq
    for t in (512, 256, 128):
        if sq % t == 0:
            return t
    return 128   # ragged last block handled by Pallas padding/masking


def multi_headed_attention(xq, xk, xv, mask, params, *, num_heads):
    """MultiHeadedAttention.forward.  xq:(B,Sq,D), xk/xv:(B,Sk,D),
    mask: None or broadcastable to (B,Sq,Sk) (query dim may be 1).
    Weights are stored (in,out) so the kernel computes x @ W + b."""
    B, Sq, D = xq.shape
    _, Sk, _ = xk.shape
    assert D % num_heads == 0
    d_k = D // num_heads
    wq, bq, wk, bk, wv, bv, wo, bo = params
    out_dtype = xq.dtype

    # bf16 MXU operands (half the HBM/VMEM for activations & weights); f32 bias.
    xq_b, xk_b, xv_b = (x.astype(jnp.bfloat16) for x in (xq, xk, xv))
    wq_b, wk_b, wv_b, wo_b = (w.astype(jnp.bfloat16) for w in (wq, wk, wv, wo))
    bq2, bk2, bv2, bo2 = (b.reshape(1, D).astype(jnp.float32)
                          for b in (bq, bk, bv, bo))

    # Additive mask bias at the mask's native query extent (no Sq x blowup).
    if mask is None:
        mbias = jnp.zeros((B, 1, Sk), jnp.float32)
    else:
        mask = jnp.asarray(mask)
        mq = mask.shape[-2] if mask.ndim >= 2 else 1
        mask_b = jnp.broadcast_to(mask, (B, mq, Sk))
        mbias = jnp.where(mask_b == 0, jnp.float32(NEG_INF), jnp.float32(0.0))
    Mq = mbias.shape[1]

    tq = _choose_tq(Sq)
    nq = pl.cdiv(Sq, tq)

    if Mq == 1:
        mspec = pl.BlockSpec((1, 1, Sk), lambda b, qi: (b, 0, 0))
        mq_blk = 1
    else:
        mspec = pl.BlockSpec((1, tq, Sk), lambda b, qi: (b, qi, 0))
        mq_blk = tq

    wspec = pl.BlockSpec((D, D), lambda b, qi: (0, 0))
    bspec = pl.BlockSpec((1, D), lambda b, qi: (0, 0))

    itemsize_out = jnp.dtype(out_dtype).itemsize

    # Advisory cost estimate for the XLA scheduler.
    flops = (2 * B * (2 * Sq + 2 * Sk) * D * D          # 4 projections
             + 4 * B * num_heads * Sq * Sk * d_k)       # QK^T and PV
    transcendentals = B * num_heads * Sq * (Sk + 1)     # exp + reciprocal
    bytes_accessed = (2 * (xq_b.size + xk_b.size + xv_b.size)
                      + 4 * mbias.size
                      + 2 * 4 * D * D + 4 * 4 * D
                      + itemsize_out * B * Sq * D)

    # VMEM budget derived from block shapes (double-buffered ins/outs +
    # persistent scratch + in-flight f32 temporaries), 2x headroom, 64 MiB cap.
    blk_bytes = (2 * tq * D * 2                 # xq tile (bf16, 2 buffers)
                 + 2 * 2 * Sk * D * 2           # xk, xv
                 + 2 * mq_blk * Sk * 4          # mask bias
                 + 2 * 4 * D * D * 2            # weights
                 + 2 * 4 * D * 4                # biases
                 + 2 * tq * D * itemsize_out)   # output tile
    scratch_bytes = 2 * Sk * D * 2 + tq * D * 4
    temp_bytes = (tq * D + 2 * Sk * D) * 4 + 3 * tq * Sk * 4 + tq * D * 4
    vmem_limit = int(min(max(2 * (blk_bytes + scratch_bytes + temp_bytes),
                             8 * 1024 * 1024), 64 * 1024 * 1024))

    kernel = partial(_mha_kernel, num_heads=num_heads, d_k=d_k,
                     scale=1.0 / math.sqrt(d_k))

    return pl.pallas_call(
        kernel,
        out_shape=jax.ShapeDtypeStruct((B, Sq, D), out_dtype),
        grid_spec=pltpu.PrefetchScalarGridSpec(
            num_scalar_prefetch=0,
            grid=(B, nq),
            in_specs=[
                mspec,
                pl.BlockSpec((1, tq, D), lambda b, qi: (b, qi, 0)),
                pl.BlockSpec((1, Sk, D), lambda b, qi: (b, 0, 0)),
                pl.BlockSpec((1, Sk, D), lambda b, qi: (b, 0, 0)),
                wspec, bspec, wspec, bspec, wspec, bspec, wspec, bspec,
            ],
            out_specs=pl.BlockSpec((1, tq, D), lambda b, qi: (b, qi, 0)),
            scratch_shapes=[
                pltpu.VMEM((Sk, D), jnp.bfloat16),   # projected K (per batch)
                pltpu.VMEM((Sk, D), jnp.bfloat16),   # projected V (per batch)
                pltpu.VMEM((tq, D), jnp.float32),    # context slab
            ],
        ),
        compiler_params=pltpu.CompilerParams(
            dimension_semantics=("parallel", "arbitrary"),
            vmem_limit_bytes=vmem_limit,
        ),
        cost_estimate=pl.CostEstimate(
            flops=flops,
            transcendentals=transcendentals,
            bytes_accessed=bytes_accessed,
        ),
    )(mbias, xq_b, xk_b, xv_b,
      wq_b, bq2, wk_b, bk2, wv_b, bv2, wo_b, bo2)


if __name__ == "__main__":
    key = jax.random.PRNGKey(0)
    B, Sq, Sk, D, H = 2, 8, 16, 32, 4        # batch, tgt len, src len, d_model, heads
    d_k = D // H

    keys = jax.random.split(key, 11)
    xq = jax.random.normal(keys[0], (B, Sq, D), dtype=jnp.float32)
    xk = jax.random.normal(keys[1], (B, Sk, D), dtype=jnp.float32)
    xv = jax.random.normal(keys[2], (B, Sk, D), dtype=jnp.float32)

    def init_linear(kw, kb):
        # nn.Linear default init: U(-1/sqrt(fan_in), 1/sqrt(fan_in)).
        bound = 1.0 / math.sqrt(D)
        w = jax.random.uniform(kw, (D, D), jnp.float32, -bound, bound)
        b = jax.random.uniform(kb, (D,), jnp.float32, -bound, bound)
        return w, b

    wq, bq = init_linear(keys[3], keys[4])
    wk, bk = init_linear(keys[5], keys[6])
    wv, bv = init_linear(keys[7], keys[8])
    wo, bo = init_linear(keys[9], keys[10])

    # Padding-style source mask: last 4 keys are masked out for every query.
    mask = jnp.concatenate(
        [jnp.ones((B, 1, Sk - 4), jnp.float32),
         jnp.zeros((B, 1, 4), jnp.float32)], axis=-1)

    out = multi_headed_attention(
        xq, xk, xv, mask, (wq, bq, wk, bk, wv, bv, wo, bo), num_heads=H)
    out = jax.block_until_ready(out)

    # Pure-JAX f32 reference of the PyTorch forward (dropout identity in eval).
    q = (xq @ wq + bq).reshape(B, Sq, H, d_k).transpose(0, 2, 1, 3)
    k = (xk @ wk + bk).reshape(B, Sk, H, d_k).transpose(0, 2, 1, 3)
    v = (xv @ wv + bv).reshape(B, Sk, H, d_k).transpose(0, 2, 1, 3)
    s = jnp.einsum("bhqd,bhkd->bhqk", q, k) / math.sqrt(d_k)
    mfull = jnp.broadcast_to(mask, (B, Sq, Sk))[:, None, :, :]
    s = jnp.where(mfull == 0, NEG_INF, s)
    p = jax.nn.softmax(s, axis=-1)
    ctx = jnp.einsum("bhqk,bhkd->bhqd", p, v).transpose(0, 2, 1, 3).reshape(B, Sq, D)
    ref = ctx @ wo + bo

    # bf16 MXU path -> tolerance loosened vs the pure-f32 reference.
    max_err = jnp.max(jnp.abs(out - ref))
    assert jnp.allclose(out, ref, atol=3e-2, rtol=3e-2), \
        f"mismatch vs reference (max abs err {max_err})"

    print("KERNEL_OK")
</pallas_src>

<mosaic_0001>
module attributes {stable_mosaic.version = 11 : i64} {
  func.func @_mha_kernel(%arg0: i32, %arg1: i32, %arg2: memref<1x1x16xf32, #tpu.memory_space<vmem>>, %arg3: memref<1x8x32xbf16, #tpu.memory_space<vmem>>, %arg4: memref<1x16x32xbf16, #tpu.memory_space<vmem>>, %arg5: memref<1x16x32xbf16, #tpu.memory_space<vmem>>, %arg6: memref<32x32xbf16, #tpu.memory_space<vmem>>, %arg7: memref<1x32xf32, #tpu.memory_space<vmem>>, %arg8: memref<32x32xbf16, #tpu.memory_space<vmem>>, %arg9: memref<1x32xf32, #tpu.memory_space<vmem>>, %arg10: memref<32x32xbf16, #tpu.memory_space<vmem>>, %arg11: memref<1x32xf32, #tpu.memory_space<vmem>>, %arg12: memref<32x32xbf16, #tpu.memory_space<vmem>>, %arg13: memref<1x32xf32, #tpu.memory_space<vmem>>, %arg14: memref<1x8x32xf32, #tpu.memory_space<vmem>>, %arg15: memref<16x32xbf16, #tpu.memory_space<vmem>>, %arg16: memref<16x32xbf16, #tpu.memory_space<vmem>>, %arg17: memref<8x32xf32, #tpu.memory_space<vmem>>) attributes {dimension_semantics = [#tpu.dimension_semantics<parallel>, #tpu.dimension_semantics<arbitrary>], iteration_bounds = array<i64: 2, 1>, scalar_prefetch = 0 : i64, scratch_operands = 3 : i64, tpu.core_type = #tpu.core_type<tc>, window_params = [{transform_indices = @transform_0, window_bounds = array<i64: 1, 1, 16>}, {transform_indices = @transform_1, window_bounds = array<i64: 1, 8, 32>}, {transform_indices = @transform_2, window_bounds = array<i64: 1, 16, 32>}, {transform_indices = @transform_3, window_bounds = array<i64: 1, 16, 32>}, {pipeline_mode = #tpu.pipeline_mode<synchronous>, transform_indices = @transform_4, window_bounds = array<i64: 32, 32>}, {pipeline_mode = #tpu.pipeline_mode<synchronous>, transform_indices = @transform_5, window_bounds = array<i64: 1, 32>}, {pipeline_mode = #tpu.pipeline_mode<synchronous>, transform_indices = @transform_6, window_bounds = array<i64: 32, 32>}, {pipeline_mode = #tpu.pipeline_mode<synchronous>, transform_indices = @transform_7, window_bounds = array<i64: 1, 32>}, {pipeline_mode = #tpu.pipeline_mode<synchronous>, transform_indices = @transform_8, window_bounds = array<i64: 32, 32>}, {pipeline_mode = #tpu.pipeline_mode<synchronous>, transform_indices = @transform_9, window_bounds = array<i64: 1, 32>}, {pipeline_mode = #tpu.pipeline_mode<synchronous>, transform_indices = @transform_10, window_bounds = array<i64: 32, 32>}, {pipeline_mode = #tpu.pipeline_mode<synchronous>, transform_indices = @transform_11, window_bounds = array<i64: 1, 32>}, {transform_indices = @transform_12, window_bounds = array<i64: 1, 8, 32>}]} {
    %c0_i32 = arith.constant 0 : i32
    %0 = arith.cmpi eq, %arg1, %c0_i32 : i32
    %1 = arith.extui %0 : i1 to i32
    %c0_i32_0 = arith.constant 0 : i32
    %2 = arith.cmpi ne, %1, %c0_i32_0 : i32
    scf.if %2 {
      %c0_58 = arith.constant 0 : index
      %c0_59 = arith.constant 0 : index
      %c0_60 = arith.constant 0 : index
      %99 = vector.load %arg4[%c0_58, %c0_59, %c0_60] : memref<1x16x32xbf16, #tpu.memory_space<vmem>>, vector<1x16x32xbf16>
      %100 = vector.shape_cast %99 : vector<1x16x32xbf16> to vector<16x32xbf16>
      %c0_61 = arith.constant 0 : index
      %c0_62 = arith.constant 0 : index
      %101 = vector.load %arg8[%c0_61, %c0_62] : memref<32x32xbf16, #tpu.memory_space<vmem>>, vector<32x32xbf16>
      %cst_63 = arith.constant dense<0.000000e+00> : vector<16x32xf32>
      %102 = tpu.matmul %100, %101, %cst_63 {dimension_numbers = #tpu.dot_dimension_numbers<[1], [0], [0], [1], [0, 0, 1, 1], [], []>} : vector<16x32xbf16>, vector<32x32xbf16>, vector<16x32xf32> -> vector<16x32xf32>
      %c0_64 = arith.constant 0 : index
      %c0_65 = arith.constant 0 : index
      %103 = vector.load %arg9[%c0_64, %c0_65] : memref<1x32xf32, #tpu.memory_space<vmem>>, vector<1x32xf32>
      %104 = vector.broadcast %103 : vector<1x32xf32> to vector<16x32xf32>
      %105 = arith.addf %102, %104 : vector<16x32xf32>
      %c0_66 = arith.constant 0 : index
      %c0_67 = arith.constant 0 : index
      %c0_68 = arith.constant 0 : index
      %106 = vector.load %arg5[%c0_66, %c0_67, %c0_68] : memref<1x16x32xbf16, #tpu.memory_space<vmem>>, vector<1x16x32xbf16>
      %107 = vector.shape_cast %106 : vector<1x16x32xbf16> to vector<16x32xbf16>
      %c0_69 = arith.constant 0 : index
      %c0_70 = arith.constant 0 : index
      %108 = vector.load %arg10[%c0_69, %c0_70] : memref<32x32xbf16, #tpu.memory_space<vmem>>, vector<32x32xbf16>
      %cst_71 = arith.constant dense<0.000000e+00> : vector<16x32xf32>
      %109 = tpu.matmul %107, %108, %cst_71 {dimension_numbers = #tpu.dot_dimension_numbers<[1], [0], [0], [1], [0, 0, 1, 1], [], []>} : vector<16x32xbf16>, vector<32x32xbf16>, vector<16x32xf32> -> vector<16x32xf32>
      %c0_72 = arith.constant 0 : index
      %c0_73 = arith.constant 0 : index
      %110 = vector.load %arg11[%c0_72, %c0_73] : memref<1x32xf32, #tpu.memory_space<vmem>>, vector<1x32xf32>
      %111 = vector.broadcast %110 : vector<1x32xf32> to vector<16x32xf32>
      %112 = arith.addf %109, %111 : vector<16x32xf32>
      %113 = arith.truncf %105 : vector<16x32xf32> to vector<16x32xbf16>
      %c0_74 = arith.constant 0 : index
      %c0_75 = arith.constant 0 : index
      %114 = vector.load %arg15[%c0_74, %c0_75] : memref<16x32xbf16, #tpu.memory_space<vmem>>, vector<16x32xbf16>
      tpu.vector_store %arg15[%c0_74, %c0_75], %113 {strides = array<i32>} : memref<16x32xbf16, #tpu.memory_space<vmem>>, vector<16x32xbf16>,
      %115 = arith.truncf %112 : vector<16x32xf32> to vector<16x32xbf16>
      %c0_76 = arith.constant 0 : index
      %c0_77 = arith.constant 0 : index
      %116 = vector.load %arg16[%c0_76, %c0_77] : memref<16x32xbf16, #tpu.memory_space<vmem>>, vector<16x32xbf16>
      tpu.vector_store %arg16[%c0_76, %c0_77], %115 {strides = array<i32>} : memref<16x32xbf16, #tpu.memory_space<vmem>>, vector<16x32xbf16>,
    } else {
    }
    %c0 = arith.constant 0 : index
    %c0_1 = arith.constant 0 : index
    %c0_2 = arith.constant 0 : index
    %3 = vector.load %arg3[%c0, %c0_1, %c0_2] : memref<1x8x32xbf16, #tpu.memory_space<vmem>>, vector<1x8x32xbf16>
    %4 = vector.shape_cast %3 : vector<1x8x32xbf16> to vector<8x32xbf16>
    %c0_3 = arith.constant 0 : index
    %c0_4 = arith.constant 0 : index
    %5 = vector.load %arg6[%c0_3, %c0_4] : memref<32x32xbf16, #tpu.memory_space<vmem>>, vector<32x32xbf16>
    %cst = arith.constant dense<0.000000e+00> : vector<8x32xf32>
    %6 = tpu.matmul %4, %5, %cst {dimension_numbers = #tpu.dot_dimension_numbers<[1], [0], [0], [1], [0, 0, 1, 1], [], []>} : vector<8x32xbf16>, vector<32x32xbf16>, vector<8x32xf32> -> vector<8x32xf32>
    %c0_5 = arith.constant 0 : index
    %c0_6 = arith.constant 0 : index
    %7 = vector.load %arg7[%c0_5, %c0_6] : memref<1x32xf32, #tpu.memory_space<vmem>>, vector<1x32xf32>
    %8 = vector.broadcast %7 : vector<1x32xf32> to vector<8x32xf32>
    %9 = arith.addf %6, %8 : vector<8x32xf32>
    %cst_7 = arith.constant 0.353553385 : f32
    %10 = vector.broadcast %cst_7 : f32 to vector<8x32xf32>
    %11 = arith.mulf %9, %10 : vector<8x32xf32>
    %12 = arith.truncf %11 : vector<8x32xf32> to vector<8x32xbf16>
    %c0_8 = arith.constant 0 : index
    %c0_9 = arith.constant 0 : index
    %c0_10 = arith.constant 0 : index
    %13 = vector.load %arg2[%c0_8, %c0_9, %c0_10] : memref<1x1x16xf32, #tpu.memory_space<vmem>>, vector<1x1x16xf32>
    %14 = vector.shape_cast %13 : vector<1x1x16xf32> to vector<1x16xf32>
    %15 = vector.shape_cast %14 : vector<1x16xf32> to vector<1x16xf32>
    %16 = vector.broadcast %15 : vector<1x16xf32> to vector<8x16xf32>
    %17 = vector.extract_strided_slice %12 {offsets = [0, 0], sizes = [8, 8], strides = [1, 1]} : vector<8x32xbf16> to vector<8x8xbf16>
    %c0_11 = arith.constant 0 : index
    %c0_12 = arith.constant 0 : index
    %18 = vector.load %arg15[%c0_11, %c0_12] : memref<16x32xbf16, #tpu.memory_space<vmem>>, vector<16x8xbf16>
    %c0_13 = arith.constant 0 : index
    %c0_14 = arith.constant 0 : index
    %19 = vector.load %arg16[%c0_13, %c0_14] : memref<16x32xbf16, #tpu.memory_space<vmem>>, vector<16x8xbf16>
    %cst_15 = arith.constant dense<0.000000e+00> : vector<8x16xf32>
    %20 = tpu.matmul %17, %18, %cst_15 {dimension_numbers = #tpu.dot_dimension_numbers<[1], [1], [0], [0], [0, 0, 1, 0], [], []>} : vector<8x8xbf16>, vector<16x8xbf16>, vector<8x16xf32> -> vector<8x16xf32>
    %21 = arith.addf %20, %16 : vector<8x16xf32>
    %cst_16 = arith.constant dense<0xFF800000> : vector<8xf32>
    %22 = vector.multi_reduction <maximumf>, %21, %cst_16 [1] : vector<8x16xf32> to vector<8xf32>
    %23 = vector.shape_cast %22 : vector<8xf32> to vector<8x1xf32>
    %24 = vector.broadcast %23 : vector<8x1xf32> to vector<8x16xf32>
    %25 = arith.subf %21, %24 : vector<8x16xf32>
    %26 = math.exp %25 : vector<8x16xf32>
    %cst_17 = arith.constant dense<0.000000e+00> : vector<8xf32>
    %27 = vector.multi_reduction <add>, %26, %cst_17 [1] : vector<8x16xf32> to vector<8xf32>
    %28 = vector.shape_cast %27 : vector<8xf32> to vector<8x1xf32>
    %29 = tpu.reciprocal %28 {approx = true} : vector<8x1xf32> -> vector<8x1xf32>
    %30 = vector.broadcast %29 : vector<8x1xf32> to vector<8x16xf32>
    %31 = arith.mulf %26, %30 : vector<8x16xf32>
    %32 = arith.truncf %31 : vector<8x16xf32> to vector<8x16xbf16>
    %cst_18 = arith.constant dense<0.000000e+00> : vector<8x8xf32>
    %33 = tpu.matmul %32, %19, %cst_18 {dimension_numbers = #tpu.dot_dimension_numbers<[1], [0], [0], [1], [0, 0, 1, 1], [], []>} : vector<8x16xbf16>, vector<16x8xbf16>, vector<8x8xf32> -> vector<8x8xf32>
    %c0_19 = arith.constant 0 : index
    %c0_20 = arith.constant 0 : index
    %34 = vector.load %arg17[%c0_19, %c0_20] : memref<8x32xf32, #tpu.memory_space<vmem>>, vector<8x8xf32>
    tpu.vector_store %arg17[%c0_19, %c0_20], %33 {strides = array<i32>} : memref<8x32xf32, #tpu.memory_space<vmem>>, vector<8x8xf32>,
    %35 = vector.extract_strided_slice %12 {offsets = [0, 8], sizes = [8, 8], strides = [1, 1]} : vector<8x32xbf16> to vector<8x8xbf16>
    %c0_21 = arith.constant 0 : index
    %c8 = arith.constant 8 : index
    %36 = vector.load %arg15[%c0_21, %c8] : memref<16x32xbf16, #tpu.memory_space<vmem>>, vector<16x8xbf16>
    %c0_22 = arith.constant 0 : index
    %c8_23 = arith.constant 8 : index
    %37 = vector.load %arg16[%c0_22, %c8_23] : memref<16x32xbf16, #tpu.memory_space<vmem>>, vector<16x8xbf16>
    %cst_24 = arith.constant dense<0.000000e+00> : vector<8x16xf32>
    %38 = tpu.matmul %35, %36, %cst_24 {dimension_numbers = #tpu.dot_dimension_numbers<[1], [1], [0], [0], [0, 0, 1, 0], [], []>} : vector<8x8xbf16>, vector<16x8xbf16>, vector<8x16xf32> -> vector<8x16xf32>
    %39 = arith.addf %38, %16 : vector<8x16xf32>
    %cst_25 = arith.constant dense<0xFF800000> : vector<8xf32>
    %40 = vector.multi_reduction <maximumf>, %39, %cst_25 [1] : vector<8x16xf32> to vector<8xf32>
    %41 = vector.shape_cast %40 : vector<8xf32> to vector<8x1xf32>
    %42 = vector.broadcast %41 : vector<8x1xf32> to vector<8x16xf32>
    %43 = arith.subf %39, %42 : vector<8x16xf32>
    %44 = math.exp %43 : vector<8x16xf32>
    %cst_26 = arith.constant dense<0.000000e+00> : vector<8xf32>
    %45 = vector.multi_reduction <add>, %44, %cst_26 [1] : vector<8x16xf32> to vector<8xf32>
    %46 = vector.shape_cast %45 : vector<8xf32> to vector<8x1xf32>
    %47 = tpu.reciprocal %46 {approx = true} : vector<8x1xf32> -> vector<8x1xf32>
    %48 = vector.broadcast %47 : vector<8x1xf32> to vector<8x16xf32>
    %49 = arith.mulf %44, %48 : vector<8x16xf32>
    %50 = arith.truncf %49 : vector<8x16xf32> to vector<8x16xbf16>
    %cst_27 = arith.constant dense<0.000000e+00> : vector<8x8xf32>
    %51 = tpu.matmul %50, %37, %cst_27 {dimension_numbers = #tpu.dot_dimension_numbers<[1], [0], [0], [1], [0, 0, 1, 1], [], []>} : vector<8x16xbf16>, vector<16x8xbf16>, vector<8x8xf32> -> vector<8x8xf32>
    %c0_28 = arith.constant 0 : index
    %c8_29 = arith.constant 8 : index
    %52 = vector.load %arg17[%c0_28, %c8_29] : memref<8x32xf32, #tpu.memory_space<vmem>>, vector<8x8xf32>
    tpu.vector_store %arg17[%c0_28, %c8_29], %51 {strides = array<i32>} : memref<8x32xf32, #tpu.memory_space<vmem>>, vector<8x8xf32>,
    %53 = vector.extract_strided_slice %12 {offsets = [0, 16], sizes = [8, 8], strides = [1, 1]} : vector<8x32xbf16> to vector<8x8xbf16>
    %c0_30 = arith.constant 0 : index
    %c16 = arith.constant 16 : index
    %54 = vector.load %arg15[%c0_30, %c16] : memref<16x32xbf16, #tpu.memory_space<vmem>>, vector<16x8xbf16>
    %c0_31 = arith.constant 0 : index
    %c16_32 = arith.constant 16 : index
    %55 = vector.load %arg16[%c0_31, %c16_32] : memref<16x32xbf16, #tpu.memory_space<vmem>>, vector<16x8xbf16>
    %cst_33 = arith.constant dense<0.000000e+00> : vector<8x16xf32>
    %56 = tpu.matmul %53, %54, %cst_33 {dimension_numbers = #tpu.dot_dimension_numbers<[1], [1], [0], [0], [0, 0, 1, 0], [], []>} : vector<8x8xbf16>, vector<16x8xbf16>, vector<8x16xf32> -> vector<8x16xf32>
    %57 = arith.addf %56, %16 : vector<8x16xf32>
    %cst_34 = arith.constant dense<0xFF800000> : vector<8xf32>
    %58 = vector.multi_reduction <maximumf>, %57, %cst_34 [1] : vector<8x16xf32> to vector<8xf32>
    %59 = vector.shape_cast %58 : vector<8xf32> to vector<8x1xf32>
    %60 = vector.broadcast %59 : vector<8x1xf32> to vector<8x16xf32>
    %61 = arith.subf %57, %60 : vector<8x16xf32>
    %62 = math.exp %61 : vector<8x16xf32>
    %cst_35 = arith.constant dense<0.000000e+00> : vector<8xf32>
    %63 = vector.multi_reduction <add>, %62, %cst_35 [1] : vector<8x16xf32> to vector<8xf32>
    %64 = vector.shape_cast %63 : vector<8xf32> to vector<8x1xf32>
    %65 = tpu.reciprocal %64 {approx = true} : vector<8x1xf32> -> vector<8x1xf32>
    %66 = vector.broadcast %65 : vector<8x1xf32> to vector<8x16xf32>
    %67 = arith.mulf %62, %66 : vector<8x16xf32>
    %68 = arith.truncf %67 : vector<8x16xf32> to vector<8x16xbf16>
    %cst_36 = arith.constant dense<0.000000e+00> : vector<8x8xf32>
    %69 = tpu.matmul %68, %55, %cst_36 {dimension_numbers = #tpu.dot_dimension_numbers<[1], [0], [0], [1], [0, 0, 1, 1], [], []>} : vector<8x16xbf16>, vector<16x8xbf16>, vector<8x8xf32> -> vector<8x8xf32>
    %c0_37 = arith.constant 0 : index
    %c16_38 = arith.constant 16 : index
    %70 = vector.load %arg17[%c0_37, %c16_38] : memref<8x32xf32, #tpu.memory_space<vmem>>, vector<8x8xf32>
    tpu.vector_store %arg17[%c0_37, %c16_38], %69 {strides = array<i32>} : memref<8x32xf32, #tpu.memory_space<vmem>>, vector<8x8xf32>,
    %71 = vector.extract_strided_slice %12 {offsets = [0, 24], sizes = [8, 8], strides = [1, 1]} : vector<8x32xbf16> to vector<8x8xbf16>
    %c0_39 = arith.constant 0 : index
    %c24 = arith.constant 24 : index
    %72 = vector.load %arg15[%c0_39, %c24] : memref<16x32xbf16, #tpu.memory_space<vmem>>, vector<16x8xbf16>
    %c0_40 = arith.constant 0 : index
    %c24_41 = arith.constant 24 : index
    %73 = vector.load %arg16[%c0_40, %c24_41] : memref<16x32xbf16, #tpu.memory_space<vmem>>, vector<16x8xbf16>
    %cst_42 = arith.constant dense<0.000000e+00> : vector<8x16xf32>
    %74 = tpu.matmul %71, %72, %cst_42 {dimension_numbers = #tpu.dot_dimension_numbers<[1], [1], [0], [0], [0, 0, 1, 0], [], []>} : vector<8x8xbf16>, vector<16x8xbf16>, vector<8x16xf32> -> vector<8x16xf32>
    %75 = arith.addf %74, %16 : vector<8x16xf32>
    %cst_43 = arith.constant dense<0xFF800000> : vector<8xf32>
    %76 = vector.multi_reduction <maximumf>, %75, %cst_43 [1] : vector<8x16xf32> to vector<8xf32>
    %77 = vector.shape_cast %76 : vector<8xf32> to vector<8x1xf32>
    %78 = vector.broadcast %77 : vector<8x1xf32> to vector<8x16xf32>
    %79 = arith.subf %75, %78 : vector<8x16xf32>
    %80 = math.exp %79 : vector<8x16xf32>
    %cst_44 = arith.constant dense<0.000000e+00> : vector<8xf32>
    %81 = vector.multi_reduction <add>, %80, %cst_44 [1] : vector<8x16xf32> to vector<8xf32>
    %82 = vector.shape_cast %81 : vector<8xf32> to vector<8x1xf32>
    %83 = tpu.reciprocal %82 {approx = true} : vector<8x1xf32> -> vector<8x1xf32>
    %84 = vector.broadcast %83 : vector<8x1xf32> to vector<8x16xf32>
    %85 = arith.mulf %80, %84 : vector<8x16xf32>
    %86 = arith.truncf %85 : vector<8x16xf32> to vector<8x16xbf16>
    %cst_45 = arith.constant dense<0.000000e+00> : vector<8x8xf32>
    %87 = tpu.matmul %86, %73, %cst_45 {dimension_numbers = #tpu.dot_dimension_numbers<[1], [0], [0], [1], [0, 0, 1, 1], [], []>} : vector<8x16xbf16>, vector<16x8xbf16>, vector<8x8xf32> -> vector<8x8xf32>
    %c0_46 = arith.constant 0 : index
    %c24_47 = arith.constant 24 : index
    %88 = vector.load %arg17[%c0_46, %c24_47] : memref<8x32xf32, #tpu.memory_space<vmem>>, vector<8x8xf32>
    tpu.vector_store %arg17[%c0_46, %c24_47], %87 {strides = array<i32>} : memref<8x32xf32, #tpu.memory_space<vmem>>, vector<8x8xf32>,
    %c0_48 = arith.constant 0 : index
    %c0_49 = arith.constant 0 : index
    %89 = vector.load %arg17[%c0_48, %c0_49] : memref<8x32xf32, #tpu.memory_space<vmem>>, vector<8x32xf32>
    %90 = arith.truncf %89 : vector<8x32xf32> to vector<8x32xbf16>
    %c0_50 = arith.constant 0 : index
    %c0_51 = arith.constant 0 : index
    %91 = vector.load %arg12[%c0_50, %c0_51] : memref<32x32xbf16, #tpu.memory_space<vmem>>, vector<32x32xbf16>
    %cst_52 = arith.constant dense<0.000000e+00> : vector<8x32xf32>
    %92 = tpu.matmul %90, %91, %cst_52 {dimension_numbers = #tpu.dot_dimension_numbers<[1], [0], [0], [1], [0, 0, 1, 1], [], []>} : vector<8x32xbf16>, vector<32x32xbf16>, vector<8x32xf32> -> vector<8x32xf32>
    %c0_53 = arith.constant 0 : index
    %c0_54 = arith.constant 0 : index
    %93 = vector.load %arg13[%c0_53, %c0_54] : memref<1x32xf32, #tpu.memory_space<vmem>>, vector<1x32xf32>
    %94 = vector.broadcast %93 : vector<1x32xf32> to vector<8x32xf32>
    %95 = arith.addf %92, %94 : vector<8x32xf32>
    %c0_55 = arith.constant 0 : index
    %c0_56 = arith.constant 0 : index
    %c0_57 = arith.constant 0 : index
    %96 = vector.load %arg14[%c0_55, %c0_56, %c0_57] : memref<1x8x32xf32, #tpu.memory_space<vmem>>, vector<1x8x32xf32>
    %97 = vector.shape_cast %96 : vector<1x8x32xf32> to vector<8x32xf32>
    %98 = vector.shape_cast %95 : vector<8x32xf32> to vector<1x8x32xf32>
    tpu.vector_store %arg14[%c0_55, %c0_56, %c0_57], %98 {strides = array<i32>} : memref<1x8x32xf32, #tpu.memory_space<vmem>>, vector<1x8x32xf32>,
    return
  }
  func.func @transform_0(%arg0: i32, %arg1: i32) -> (i32, i32, i32) {
    %c0_i32 = arith.constant 0 : i32
    %c0_i32_0 = arith.constant 0 : i32
    %c0_i32_1 = arith.constant 0 : i32
    return %arg0, %c0_i32, %c0_i32_0 : i32, i32, i32
  }
  func.func @transform_1(%arg0: i32, %arg1: i32) -> (i32, i32, i32) {
    %c0_i32 = arith.constant 0 : i32
    %c0_i32_0 = arith.constant 0 : i32
    return %arg0, %arg1, %c0_i32 : i32, i32, i32
  }
  func.func @transform_2(%arg0: i32, %arg1: i32) -> (i32, i32, i32) {
    %c0_i32 = arith.constant 0 : i32
    %c0_i32_0 = arith.constant 0 : i32
    %c0_i32_1 = arith.constant 0 : i32
    return %arg0, %c0_i32, %c0_i32_0 : i32, i32, i32
  }
  func.func @transform_3(%arg0: i32, %arg1: i32) -> (i32, i32, i32) {
    %c0_i32 = arith.constant 0 : i32
    %c0_i32_0 = arith.constant 0 : i32
    %c0_i32_1 = arith.constant 0 : i32
    return %arg0, %c0_i32, %c0_i32_0 : i32, i32, i32
  }
  func.func @transform_4(%arg0: i32, %arg1: i32) -> (i32, i32) {
    %c0_i32 = arith.constant 0 : i32
    %c0_i32_0 = arith.constant 0 : i32
    %c0_i32_1 = arith.constant 0 : i32
    return %c0_i32, %c0_i32_0 : i32, i32
  }
  func.func @transform_5(%arg0: i32, %arg1: i32) -> (i32, i32) {
    %c0_i32 = arith.constant 0 : i32
    %c0_i32_0 = arith.constant 0 : i32
    %c0_i32_1 = arith.constant 0 : i32
    return %c0_i32, %c0_i32_0 : i32, i32
  }
  func.func @transform_6(%arg0: i32, %arg1: i32) -> (i32, i32) {
    %c0_i32 = arith.constant 0 : i32
    %c0_i32_0 = arith.constant 0 : i32
    %c0_i32_1 = arith.constant 0 : i32
    return %c0_i32, %c0_i32_0 : i32, i32
  }
  func.func @transform_7(%arg0: i32, %arg1: i32) -> (i32, i32) {
    %c0_i32 = arith.constant 0 : i32
    %c0_i32_0 = arith.constant 0 : i32
    %c0_i32_1 = arith.constant 0 : i32
    return %c0_i32, %c0_i32_0 : i32, i32
  }
  func.func @transform_8(%arg0: i32, %arg1: i32) -> (i32, i32) {
    %c0_i32 = arith.constant 0 : i32
    %c0_i32_0 = arith.constant 0 : i32
    %c0_i32_1 = arith.constant 0 : i32
    return %c0_i32, %c0_i32_0 : i32, i32
  }
  func.func @transform_9(%arg0: i32, %arg1: i32) -> (i32, i32) {
    %c0_i32 = arith.constant 0 : i32
    %c0_i32_0 = arith.constant 0 : i32
    %c0_i32_1 = arith.constant 0 : i32
    return %c0_i32, %c0_i32_0 : i32, i32
  }
  func.func @transform_10(%arg0: i32, %arg1: i32) -> (i32, i32) {
    %c0_i32 = arith.constant 0 : i32
    %c0_i32_0 = arith.constant 0 : i32
    %c0_i32_1 = arith.constant 0 : i32
    return %c0_i32, %c0_i32_0 : i32, i32
  }
  func.func @transform_11(%arg0: i32, %arg1: i32) -> (i32, i32) {
    %c0_i32 = arith.constant 0 : i32
    %c0_i32_0 = arith.constant 0 : i32
    %c0_i32_1 = arith.constant 0 : i32
    return %c0_i32, %c0_i32_0 : i32, i32
  }
  func.func @transform_12(%arg0: i32, %arg1: i32) -> (i32, i32, i32) {
    %c0_i32 = arith.constant 0 : i32
    %c0_i32_0 = arith.constant 0 : i32
    return %arg0, %arg1, %c0_i32 : i32, i32, i32
  }
}

</mosaic_0001>

<bundles_post_ra>
// kernel: tpu_custom_call.1
= control target key start
LH: loop header
LB: loop body
LE: loop exit
PB: predicated region body
PF: predicated region fallthrough
CT: control target
= control target key end

     0   :  { %s2303_s0 = inlined_call_operand.hbm [shape: f32[2,1,16], index: 0, kind: input, shape index: {}]   ;;  %s2304_s1 = inlined_call_operand.hbm [shape: bf16[2,8,32], index: 1, kind: input, shape index: {}]   ;;  %s2305_s2 = inlined_call_operand.hbm [shape: bf16[2,16,32], index: 2, kind: input, shape index: {}]   ;;  %s2306_s3 = inlined_call_operand.hbm [shape: bf16[2,16,32], index: 3, kind: input, shape index: {}]   ;;  %s2307_s4 = inlined_call_operand.hbm [shape: bf16[32,32], index: 4, kind: input, shape index: {}]   ;;  %s2308_s5 = inlined_call_operand.vmem [shape: f32[1,32], index: 5, kind: input, shape index: {}]   ;;  %s2309_s6 = inlined_call_operand.hbm [shape: bf16[32,32], index: 6, kind: input, shape index: {}]   ;;  %s2310_s7 = inlined_call_operand.vmem [shape: f32[1,32], index: 7, kind: input, shape index: {}]   ;;  %s2311_s8 = inlined_call_operand.hbm [shape: bf16[32,32], index: 8, kind: input, shape index: {}]   ;;  %s2312_s9 = inlined_call_operand.vmem [shape: f32[1,32], index: 9, kind: input, shape index: {}]   ;;  %s2313_s10 = inlined_call_operand.hbm [shape: bf16[32,32], index: 10, kind: input, shape index: {}]   ;;  %s2314_s11 = inlined_call_operand.vmem [shape: f32[1,32], index: 11, kind: input, shape index: {}]   ;;  %s2315_s12 = inlined_call_operand.hbm [shape: f32[2,8,32], index: 12, kind: output, shape index: {}]  }
   0x1   :  { %2327 = sst [smem:[#allocation33_spill]] %s2303_s0 }
   0x2   :  { %2328 = sst [smem:[#allocation34_spill]] %s2304_s1 }
   0x3   :  { %2329 = sst [smem:[#allocation35_spill]] %s2307_s4 }
   0x4   :  { %2330 = sst [smem:[#allocation36_spill]] %s2309_s6 }
   0x5   :  { %2331 = sst [smem:[#allocation37_spill]] %s2311_s8 }
   0x6   :  { %2332 = sst [smem:[#allocation38_spill]] %s2312_s9 }
   0x7   :  { %2333 = sst [smem:[#allocation39_spill]] %s2314_s11 }
   0x8   :  { %2334 = sst [smem:[#allocation40_spill]] %s2315_s12 }
   0x9   :  { %17 = vsyncpa [#allocation6], 0 }
   0xa   :  { %19 = vsyncpa [#allocation6 + $0x1], 0 }
   0xb   :  { %20 = vsyncpa [#allocation9], 0 }
   0xc   :  { %22 = vsyncpa [#allocation9 + $0x1], 0 }
   0xd   :  { %23 = vsyncpa [#allocation12], 0 }
   0xe   :  { %25 = vsyncpa [#allocation12 + $0x1], 0 }
   0xf   :  { %26 = vsyncpa [#allocation15], 0 }
  0x10   :  { %27 = vsyncpa [#allocation18], 0 }
  0x11   :  { %28 = vsyncpa [#allocation7], 0 }
  0x12   :  { %30 = vsyncpa [#allocation7 + $0x1], 0  ;;  %s2004_s21 = smov 0   ;;  %s2006_s22 = smov 0  }
  0x13   :  { %s2008_s23 = smov 0   ;;  %s2010_s24 = smov 0  }
  0x14   :  { %s2012_s25 = smov 0   ;;  %s2014_s26 = smov 0  }
  0x15 LB: > { %2335 = sst [smem:[#allocation27_spill]] %s1905_s21  ;;  %s2035_s27 = sadd.s32 4294967295, %s1925_s26   ;;  %s1925_s26 = sphi %s2014_s26, %s36_s26   ;;  %s1921_s25 = sphi %s2012_s25, %s2371_s25   ;;  %s1917_s24 = sphi %s2010_s24, %s2370_s24   ;;  %s1913_s23 = sphi %s2008_s23, %s2369_s23   ;;  %s1909_s22 = sphi %s2006_s22, %s2368_s22   ;;  %s1905_s21 = sphi %s2004_s21, %s2367_s21  }
  0x16   : > { %2336 = sst [smem:[#allocation28_spill]] %s1917_s24  ;;  %s1304_s28 = sadd.s32 4294967294, %s1925_s26  }
  0x17   : > { %p68_p0 = scmp.ne.s32.totalorder %s1909_s22, %s1905_s21  ;;  %p69_p1 = scmp.eq.s32.totalorder %s2035_s27, 0 }
  0x18   : > { %p342_p2 = scmp.eq.s32.totalorder %s2035_s27, 1  ;;  %p348_p3 = scmp.eq.s32.totalorder %s1304_s28, 1 }
  0x19   : > { %p2044_p4 = por %p69_p1, %p68_p0  ;;  %p1305_p5 = scmp.ge.s32.totalorder %s1925_s26, 1 }
  0x1a   : > { %p2049_p6 = por %p348_p3, %p68_p0  ;;  %p355_p7 = scmp.lt.s32.totalorder %s1925_s26, 3 }
  0x1b   : > { %s2340_s4 = sld [smem:[#allocation35_spill]]  ;;  %s1927_s17 = smov [#allocation13]  }
  0x1c   : > { %s2338_s30 = scalar_select %p2049_p6, 1, 0 }
  0x1d   : > { %p2057_p8 = pnand %p1305_p5, %p355_p7  ;;  %s368_s18 = sshll.u32 %s1927_s17, 4  ;;  %s369_s18 = int_to_ptr.vmem [resolvable:$true] %s368_s18 }
  0x1e   : > { %2339 = sst [smem:[#allocation29_spill]] %s2338_s30  ;;  %s2317_s14 = smov 64  }
  0x1f   : > { %p1462_p9 = pneg %p2057_p8  ;;  %s2343_s6 = sld [smem:[#allocation36_spill]] }
  0x20   : > { %s2319_s17 = smov 4   ;;  %s48_s20 = sadd.s32 1, %s1921_s25 }
  0x21   : > { %s366_s15 = sshll.u32 %s2340_s4, 4  ;;  %p2065_p10 = pnand %p1462_p9, %p69_p1  ;;  %s367_s15 = int_to_ptr.hbm [resolvable:$true] %s366_s15 }
  0x22   : > { %s1930_s4 = smov [#allocation14]   ;;  %s55_s28 = sadd.s32 1, %s1913_s23 }
  0x23   : > { %1465 = dma.hbm_to_vmem [thread:$0]  (!%p2065_p10), %s367_s15, 256, %s369_s18, [#allocation12], %s2317_s14, %s2317_s14, %s2319_s17  }
  0x24   : > { %s385_s30 = sshll.u32 %s1930_s4, 4  ;;  %p50_p12 = scmp.ge.s32.totalorder %s48_s20, 2  ;;  %s386_s30 = int_to_ptr.vmem [resolvable:$true] %s385_s30 }
  0x25   : > { %s383_s13 = sshll.u32 %s2343_s6, 4  ;;  %p62_p13 = scmp.ne.s32.totalorder %s1913_s23, %s1909_s22  ;;  %s384_s13 = int_to_ptr.hbm [resolvable:$true] %s383_s13 }
  0x26   : > { %1468 = dma.hbm_to_vmem [thread:$0]  (!%p2065_p10), %s384_s13, 256, %s386_s30, [#allocation15], %s2317_s14, %s2317_s14, %s2319_s17  }
  0x27   : > { %p63_p0 = scmp.eq.s32.totalorder %s1925_s26, 0  ;;  %p1496_p3 = scmp.lt.s32.totalorder %s1925_s26, 2 }
  0x28   : > { %s2373_s20 = smov (%p50_p12, %s48_s20), 0  ;;  %p2093_p7 = por %p342_p2, %p62_p13 }
  0x29   : > { %2344 = sst [smem:[#allocation30_spill]] %s2373_s20  ;;  %p64_p5 = por %p63_p0, %p62_p13 }
  0x2a   : > { %s2345_s4 = scalar_select %p2093_p7, 1, 0 }
  0x2b   : > { %s52_s15 = ssub.s32 %s1921_s25, %s2373_s20  ;;  %s2100_s30 = sand.u32 1, %s1913_s23  }
  0x2c   : > { %2346 = sst [smem:[#allocation31_spill]] %s2345_s4  ;;  %p53_p9 = scmp.eq.s32.totalorder %s52_s15, 0 }
  0x2d   : > { %p2102_p11 = pnand %p1496_p3, %p64_p5  ;;  %s2326_s13 = sand.u32 1, %s1925_s26  }
  0x2e   : > { %s1311_s14 = sshll.u32 %s2100_s30, 2  ;;  %s1312_s6 = sshll.u32 %s1921_s25, 2 }
  0x2f   : > { %s2109_s17 = scalar_select %p53_p9, %s1913_s23, %s55_s28  }
  0x30   : > { %s2349_s1 = sld [smem:[#allocation34_spill]]  ;;  %s457_s20 = scalar_lea.vmem [#allocation8], %s1311_s14 }
  0x31   : > { %2348 = sst [smem:[#allocation32_spill]] %s2109_s17  ;;  %s466_s12 = sshll.u32 %s457_s20, 4  ;;  %s467_s12 = int_to_ptr.vmem [resolvable:$true] %s466_s12 }
  0x32   : > { %s2118_s9 = scalar_lea.sflag [#allocation9], %s2326_s13  ;;  %s2350_s8 = sld [smem:[#allocation37_spill]] }
  0x33   : > { %s1931_s11 = smov [#allocation16]   ;;  %s2351_s13 = smov 4  }
  0x34   : > { %s402_s21 = sshll.u32 %s1931_s11, 4  ;;  %s2352_s15 = smov 64   ;;  %s403_s21 = int_to_ptr.vmem [resolvable:$true] %s402_s21 }
  0x35   : > { %s2353_s0 = sld [smem:[#allocation33_spill]]  ;;  %s439_s20 = scalar_lea.vmem [#allocation5], %s2100_s30 }
  0x36   : > { %s462_s4 = scalar_lea.hbm %s2349_s1, %s1312_s6  ;;  %s446_s1 = sshll.u32 %s439_s20, 4  ;;  %s447_s1 = int_to_ptr.vmem [resolvable:$true] %s446_s1 }
  0x37   : > { %s464_s24 = sshll.u32 %s462_s4, 4  ;;  %s417_s4 = sshll.u32 %s2313_s10, 4  ;;  %s465_s24 = int_to_ptr.hbm [resolvable:$true] %s464_s24  ;;  %s418_s4 = int_to_ptr.hbm [resolvable:$true] %s417_s4 }
  0x38   : > { %1481 = dma.hbm_to_vmem [thread:$0]  (!%p2102_p11), %s465_s24, 64, %s467_s12, %s2118_s9  }
  0x39   : > { %s400_s6 = sshll.u32 %s2350_s8, 4  ;;  %s1932_s12 = smov [#allocation17]   ;;  %s401_s6 = int_to_ptr.hbm [resolvable:$true] %s400_s6 }
  0x3a   : > { %1471 = dma.hbm_to_vmem [thread:$0]  (!%p2065_p10), %s401_s6, 256, %s403_s21, [#allocation15], %s2352_s15, %s2352_s15, %s2351_s13  }
  0x3b   : > { %s419_s24 = sshll.u32 %s1932_s12, 4  ;;  %s442_s11 = scalar_lea.hbm %s2353_s0, %s1921_s25  ;;  %s420_s24 = int_to_ptr.vmem [resolvable:$true] %s419_s24 }
  0x3c   : > { %1474 = dma.hbm_to_vmem [thread:$0]  (!%p2065_p10), %s418_s4, 256, %s420_s24, [#allocation18], %s2352_s15, %s2352_s15, %s2351_s13  }
  0x3d   : > { %s444_s14 = sshll.u32 %s442_s11, 4  ;;  %s437_s6 = scalar_lea.sflag [#allocation6], %s2100_s30  ;;  %s445_s14 = int_to_ptr.hbm [resolvable:$true] %s444_s14 }
  0x3e   : > { %1478 = dma.hbm_to_vmem [thread:$0]  (!%p2102_p11), %s445_s14, 16, %s447_s1, %s437_s6  }
  0x3f   : > { %s1416_s21 = sshll.u32 %s1921_s25, 3  ;;  %s2354_s28 = sshll.u32 %s2100_s30, 3 }
  0x40   : > { %s482_s17 = scalar_lea.hbm %s2305_s2, %s1416_s21  ;;  %s477_s0 = scalar_lea.vmem [#allocation10], %s2354_s28 }
  0x41   : > { %s485_s8 = sshll.u32 %s477_s0, 4  ;;  %s483_s4 = sshll.u32 %s482_s17, 4  ;;  %s486_s8 = int_to_ptr.vmem [resolvable:$true] %s485_s8  ;;  %s484_s4 = int_to_ptr.hbm [resolvable:$true] %s483_s4 }
  0x42   : > { %1484 = dma.hbm_to_vmem [thread:$0]  (!%p2102_p11), %s484_s4, 128, %s486_s8, %s2118_s9, %s2352_s15, %s2352_s15, %s2351_s13  }
  0x43   : > { %s504_s1 = scalar_lea.hbm %s2306_s3, %s1416_s21  ;;  %s2355_s14 = smov %s2354_s28 }
  0x44   : > { %s499_s20 = scalar_lea.vmem [#allocation11], %s2355_s14  ;;  %s505_s12 = sshll.u32 %s504_s1, 4  ;;  %s506_s12 = int_to_ptr.hbm [resolvable:$true] %s505_s12 }
  0x45   : > { %s507_s6 = sshll.u32 %s499_s20, 4  ;;  %s2356_s19 = sand.u32 1, %s1925_s26   ;;  %s508_s6 = int_to_ptr.vmem [resolvable:$true] %s507_s6 }
  0x46   : > { %s496_s0 = scalar_lea.sflag [#allocation12], %s2356_s19  ;;  %519 = sbr.rel (%p2057_p8) target bundleno = 1182 (0x49e), region = 68 }
  0x47   : > { %1487 = dma.hbm_to_vmem [thread:$0]  (!%p2102_p11), %s506_s12, 128, %s508_s6, %s496_s0, %s2352_s15, %s2352_s15, %s2351_s13  }
  0x48   : > { %s2174_s8 = sand.u32 (!%p2057_p8), 1, %s1909_s22  }
  0x49   : > { %s522_s9 = scalar_lea.sflag (!%p2057_p8), [#allocation6], %s2174_s8  ;;  %s524_s30 = scalar_lea.vmem (!%p2057_p8), [#allocation5], %s2174_s8 }
  0x4b   : > { %1876 = dma.done.wait (%p2044_p4), %s522_s9, 16  }
  0x4c   : > { %1878 = vsyncadd (%p2044_p4), %s522_s9, 4294967280  ;;  %s530_s18 = sand.u32 1, %s2035_s27   ;;  %s1320_s13 = sshll.u32 %s2174_s8, 2 }
  0x4d   : > { %s531_s16 = scalar_lea.sflag [#allocation9], %s530_s18  ;;  %s534_s15 = scalar_lea.vmem [#allocation8], %s1320_s13 }
  0x4e   : > { %1880 = dma.done.wait (%p2044_p4), %s531_s16, 192  }
  0x4f   : > { %1882 = vsyncadd (%p2044_p4), %s531_s16, 4294967104  ;;  %s2189_s21 = sshll.u32 %s2174_s8, 3  ;;  %s551_s28 = scalar_lea.sflag [#allocation12], %s530_s18 }
  0x50   : > { %s544_s17 = scalar_lea.vmem [#allocation10], %s2189_s21  ;;  %s554_s4 = scalar_lea.vmem [#allocation11], %s2189_s21 }
  0x51   : > { %1884 = dma.done.wait (%p2044_p4), %s551_s28, 128  }
  0x52   : > { %1886 = vsyncadd (%p2044_p4), %s551_s28, 4294967168 }
  0x53   : > { %1888 = dma.done.wait (%p69_p1), [#allocation12], 256  }
  0x54   : > { %1890 = vsyncadd (%p69_p1), [#allocation12], 4294967040 }
  0x55   : > { %1892 = dma.done.wait (%p69_p1), [#allocation15], 512  }
  0x56   : > { %1894 = vsyncadd (%p69_p1), [#allocation15], 4294966784 }
  0x57   : > { %1896 = dma.done.wait (%p69_p1), [#allocation18], 256  }
  0x58   : > { %1898 = vsyncadd (%p69_p1), [#allocation18], 4294967040  ;;  %v1420_v0 = vld [vmem:[#allocation14 + $0x8] sm:$0xff]  ;;  %v1425_v1 = vld [vmem:[#allocation13 + $0x8] sm:$0xff]  ;;  %vm662_vm0 = vcmask 261120   ;;  %vm726_vm1 = vcmask 257024  }
  0x59   : > { %v1419_v2 = vld [vmem:[#allocation14] sm:$0xff]  ;;  %672 = vmatpush.bf16.msra.mxu0 %v1420_v0  ;;  %764 = vmatpush.bf16.msra.mxu2 %v1425_v1  ;;  %v1424_v3 = vld [vmem:[#allocation13] sm:$0xff]  ;;  %v733_v5 = vld [vmem:[%s534_s15] sm:$0xf]  ;;  %s1933_s1 = smov 112   ;;  %vm786_vm2 = vcmask 64512  }
  0x5a   : > { %v1418_v4 = vld [vmem:[%s544_s17] sm:$0xff]  ;;  %v1562_v6 = vld [vmem:[%s2310_s7] ss:$0 sm:$0xff]  ;;  %s1934_s14 = smov 120   ;;  %s1935_s20 = smov 104   ;;  %vm806_vm3 = vcmask 130048  }
  0x5b   : > { %v1563_v10 = vld [vmem:[%s2308_s5] ss:$0 sm:$0xff]  ;;  %v1423_v26 = vld [vmem:[#allocation16 + $0x8] sm:$0xff]  ;;  %v1422_v27 = vld [vmem:[#allocation16] sm:$0xff]  ;;  %s2357_s19 = sld [smem:[#allocation38_spill]]  ;;  %s1936_s0 = smov 8  }
  0x5c   : > { %716 = vmatpush.bf16.msra.mxu1 %v1423_v26  ;;  %v1421_v28 = vld [vmem:[%s554_s4] sm:$0xff]  ;;  %s1937_s9 = smov 24   ;;  %vm917_vm4 = vcmask 130112   ;;  %s2358_s18 = sld [smem:[#allocation28_spill]]  ;;  %vm991_vm5 = vcmask 195712   ;;  %vm1065_vm6 = vcmask 261312  }
  0x5d   : > { %673 = vmatpush.bf16.msra.mxu0 %v1419_v2  ;;  %765 = vmatpush.bf16.msra.mxu2 %v1424_v3  ;;  %v1564_v37 = vld [vmem:[%s524_s30] ss:$0 sm:$0xff]  ;;  %s1938_s30 = smov 16   ;;  %s2359_s17 = sld [smem:[#allocation40_spill]] }
  0x5e   : > { %s2361_s27 = sld [smem:[#allocation39_spill]]  ;;  %s629_s11 = scalar_lea.vmem [#allocation19], %s2189_s21 }
  0x60   : > { %1340 = vmatmul.msk.bf16.vlgmr.msra.gmra.mxu0 %vm662_vm0, %v1418_v4  ;;  %1362 = vmatmul.msk.bf16.vlgmr.msra.gmra.mxu2 %vm662_vm0, %v733_v5 }
  0x61   : > { %717 = vmatpush.bf16.msra.mxu1 %v1422_v27  ;;  %v1565_v43 = vld [vmem:[%s2357_s19] ss:$0 sm:$0xff] }
  0x62   : > { %s1413_s13 = sshll.u32 %s2358_s18, 3 }
  0x63   : > { %s1118_s4 = scalar_lea.hbm %s2359_s17, %s1413_s13  ;;  %s1843_s21 = scalar_lea.hbm %s2359_s17, 16 }
  0x64   : > { %1353 = vmatmul.msk.bf16.vlgmr.msra.gmra.mxu1 %vm662_vm0, %v1421_v28 }
  0xdd   : > { %v675_v7 = vpop.f32.mrf.mxu0 }
  0xde   : > { %v676_v8 = vadd.f32 %v1562_v6, %v675_v7 }
  0xe0   : > { %v724_v9 = vpack.c.bf16 %v676_v8, %v676_v8 }
  0xe1   : > { %v719_v44 = vpop.f32.mrf.mxu1 }
  0xe2   : > { %727 = vst.msk [vmem:[#allocation2] sm:$0xf] %vm726_vm1, %v724_v9  ;;  %v720_v45 = vadd.f32 %v1565_v43, %v719_v44 }
  0xe3   : > { %v767_v11 = vpop.f32.mrf.mxu2 }
  0xe4   : > { %v768_v12 = vadd.f32 %v1563_v10, %v767_v11  ;;  %v729_v46 = vpack.c.bf16 %v720_v45, %v720_v45 }
  0xe5   : > { %v677_v13 = vpop.f32.mrf.mxu0 }
  0xe6   : > { %v678_v14 = vadd.f32 %v1562_v6, %v677_v13  ;;  %v771_v15 = vmul.f32 0.35355338, %v768_v12  ;;  %731 = vst.msk [vmem:[#allocation3] sm:$0xf] %vm726_vm1, %v729_v46 }
  0xe8   : > { %v725_v16 = vpack.c.bf16 %v678_v14, %v678_v14  ;;  %v772_v17 = vpack.c.bf16 %v771_v15, %v771_v15 }
  0xe9   : > { %v721_v47 = vpop.f32.mrf.mxu1 }
  0xea   : > { %728 = vst.msk [vmem:[#allocation2 + $0x4] sm:$0xf] %vm726_vm1, %v725_v16  ;;  %v847_v18 = vunpack.c.l.b16 %v772_v17  ;;  %v722_v48 = vadd.f32 %v1565_v43, %v721_v47 }
  0xeb   : > { %v769_v19 = vpop.f32.mrf.mxu2 }
  0xec   : > { %v848_v20 = vpack.c.b16 %v847_v18, %v847_v18  ;;  %v730_v49 = vpack.c.bf16 %v722_v48, %v722_v48 }
  0xee   : > { %923 = vrot.lane.b32.xlu2 %v848_v20, %s1933_s1  ;;  %732 = vst.msk [vmem:[#allocation3 + $0x4] sm:$0xf] %vm726_vm1, %v730_v49 }
  0xf1   : > { %v1430_v21 = vld [vmem:[#allocation2] sm:$0xff] }
  0xf2   : > { %v1428_v22 = vld [vmem:[#allocation2] sm:$0xff]  ;;  %930 = vrot.lane.b32.xlu1 %v1430_v21, %s1933_s1 }
  0xf3   : > { %v1426_v23 = vld [vmem:[#allocation2] sm:$0xff]  ;;  %856 = vrot.lane.b32.xlu0 %v1428_v22, %s1934_s14 }
  0xf4   : > { %v791_v24 = vsel %vm786_vm2, %v1426_v23, 0  ;;  %v1432_v25 = vld [vmem:[#allocation2] sm:$0xff] }
  0xf5   : > { %800 = vmatpush.bf16.xpose.msra.mxu3 %v791_v24  ;;  %v1427_v50 = vld [vmem:[#allocation3] sm:$0xff] }
  0xf6   : > { %997 = vrot.lane.b32.xlu2 %v848_v20, %s1935_s20  ;;  %835 = vmatpush.bf16.msrb.mxu0 %v1427_v50  ;;  %v1429_v4 = vld [vmem:[#allocation3] sm:$0xff]  ;;  %v1435_v50 = vld [vmem:[#allocation17 + $0x8] sm:$0xff] }
  0xf7   : > { %v1431_v26 = vld [vmem:[#allocation3] sm:$0xff] }
  0xfa   : > { %1004 = vrot.lane.b32.xlu1 %v1432_v25, %s1935_s20  ;;  %v1433_v25 = vld [vmem:[#allocation3] sm:$0xff] }
  0xfb   : > { %849 = vrot.lane.b32.xlu0 %v848_v20, %s1934_s14 }
  0xfc   : > { %1367 = vmatmul.msk.bf16.vlgmr.msra.gmra.mxu3 %vm786_vm2, %v772_v17 }
 0x148   : > { %v924_v33 = vpop.permute.xlu2 %923 }
 0x150   : > { %v998_v38 = vpop.permute.xlu2 %997 }
 0x164   : > { %v931_v29 = vpop.permute.xlu1 %930 }
 0x165   : > { %v857_v30 = vpop.permute.xlu0 %856  ;;  %v936_v32 = vsel %vm786_vm2, %v931_v29, 0 }
 0x166   : > { %v862_v31 = vsel %vm786_vm2, %v857_v30, 0  ;;  %945 = vmatpush.bf16.xpose.msrb.mxu3 %v936_v32 }
 0x167   : > { %871 = vmatpush.bf16.xpose.msrb.mxu1 %v862_v31 }
 0x16c   : > { %v1005_v34 = vpop.permute.xlu1 %1004 }
 0x16d   : > { %v850_v35 = vpop.permute.xlu0 %849  ;;  %v1010_v36 = vsel %vm786_vm2, %v1005_v34, 0  ;;  %1387 = vmatmul.msk.bf16.vlgmr.msrb.gmra.mxu3 %vm786_vm2, %v924_v33 }
 0x16e   : > { %1377 = vmatmul.msk.bf16.vlgmr.msrb.gmra.mxu1 %vm786_vm2, %v850_v35  ;;  %1098 = vmatpush.bf16.msra.mxu3 %v1435_v50 }
 0x16f   : > { %1019 = vmatpush.bf16.xpose.msra.mxu1 %v1010_v36 }
 0x17e   : > { %1397 = vmatmul.msk.bf16.vlgmr.msra.gmra.mxu1 %vm786_vm2, %v998_v38 }
 0x17f   : > { %v802_v39 = vpop.f32.mrf.mxu3 }
 0x180   : > { %v803_v40 = vadd.f32 %v1564_v37, %v802_v39 }
 0x182   : > { %v807_v41 = vsel %vm806_vm3, %v803_v40, -inf }
 0x183   : > { %808 = vmax.xlane.f32.xlu1 %v807_v41 }
 0x187   : > { %v804_v42 = vpop.f32.mrf.mxu3 }
 0x1eb   : > { %v873_v51 = vpop.f32.mrf.mxu1 }
 0x1ec   : > { %v874_v52 = vadd.f32 %v1564_v37, %v873_v51  ;;  %v1434_v51 = vld [vmem:[#allocation17] sm:$0xff] }
 0x1ed   : > { %1099 = vmatpush.bf16.msra.mxu3 %v1434_v51 }
 0x1ee   : > { %v877_v53 = vsel %vm806_vm3, %v874_v52, -inf }
 0x1ef   : > { %878 = vmax.xlane.f32.xlu0 %v877_v53 }
 0x1f0   : > { %v947_v54 = vpop.f32.mrf.mxu3 }
 0x1f1   : > { %v948_v0 = vadd.f32 %v1564_v37, %v947_v54 }
 0x1f3   : > { %v875_v55 = vpop.f32.mrf.mxu1  ;;  %v951_v3 = vsel %vm806_vm3, %v948_v0, -inf }
 0x1f6   : > { %v809_v56 = vpop.xlane.xlu1 %808 }
 0x1f7   : > { %v810_v57 = vsub.f32 %v803_v40, %v809_v56  ;;  %v1566_v56 = vld [vmem:[%s2361_s27] ss:$0 sm:$0xff] }
 0x1f8   : > { %v949_v59 = vpop.f32.mrf.mxu3 }
 0x1f9   : > { %v811_v58 = vmul.f32 1.442695, %v810_v57 }
 0x1fb   : > { %1567 = vpow2.f32 %v811_v58  ;;  %v1021_v60 = vpop.f32.mrf.mxu1 }
 0x1fc   : > { %v1022_v61 = vadd.f32 %v1564_v37, %v1021_v60 }
 0x1fe   : > { %v1025_v62 = vsel %vm806_vm3, %v1022_v61, -inf }
 0x1ff   : > { %1026 = vmax.xlane.f32.xlu2 %v1025_v62 }
 0x201   : > { %v1568_v63 = vpop.eup %1567 }
 0x202   : > { %v813_v1 = vsel %vm806_vm3, %v1568_v63, 0.0 }
 0x203   : > { %814 = vadd.xlane.f32.xlu1 %v813_v1  ;;  %v1023_v2 = vpop.f32.mrf.mxu1 }
 0x207   : > { %952 = vmax.xlane.f32.xlu2 %v951_v3 }
 0x21f   : > { %894 = vrot.lane.b32.xlu2 %v1429_v4, %s1934_s14  ;;  %s1122_s14 = sshll.u32 %s1118_s4, 4  ;;  %s1123_s14 = int_to_ptr.hbm [resolvable:$true] %s1122_s14 }
 0x220   : > { %s1837_s6 = sshra.s32 %s1123_s14, 4  ;;  %s1838_s6 = int_to_ptr.hbm [resolvable:$true] %s1837_s6 }
 0x221   : > { %s1839_s12 = scalar_lea.hbm %s1838_s6, 8  ;;  %p1844_p8 = scmp.lt.s32.totalorder %s1838_s6, %s2359_s17 }
 0x222   : > { %p1840_p1 = scmp.ne.s32.totalorder %s1838_s6, %s1839_s12  ;;  %p1845_p10 = scmp.lt.s32.totalorder %s1843_s21, %s1839_s12 }
 0x224   : > { %p1841_p2 = pnand %p1840_p1, %p2093_p7  ;;  %p1846_p11 = por %p1845_p10, %p1844_p8 }
 0x226   : > { %p1842_p4 = pneg %p1841_p2 }
 0x228   : > { %p1847_p12 = pnand %p1846_p11, %p1842_p4 }
 0x262   : > { %v879_v5 = vpop.xlane.xlu0 %878 }
 0x263   : > { %v880_v6 = vsub.f32 %v874_v52, %v879_v5 }
 0x265   : > { %v881_v7 = vmul.f32 1.442695, %v880_v6 }
 0x267   : > { %1569 = vpow2.f32 %v881_v7 }
 0x26d   : > { %v1570_v8 = vpop.eup %1569 }
 0x26e   : > { %v883_v9 = vsel %vm806_vm3, %v1570_v8, 0.0 }
 0x26f   : > { %884 = vadd.xlane.f32.xlu0 %v883_v9 }
 0x272   : > { %v1027_v10 = vpop.xlane.xlu2 %1026 }
 0x273   : > { %v1028_v11 = vsub.f32 %v1022_v61, %v1027_v10 }
 0x275   : > { %v1029_v12 = vmul.f32 1.442695, %v1028_v11 }
 0x276   : > { %v815_v13 = vpop.xlane.xlu1 %814 }
 0x277   : > { %1571 = vpow2.f32 %v1029_v12 }
 0x278   : > { %1573 = vrcp.f32 %v815_v13 }
 0x27a   : > { %v953_v14 = vpop.xlane.xlu2 %952 }
 0x27b   : > { %v954_v15 = vsub.f32 %v948_v0, %v953_v14 }
 0x27d   : > { %v1572_v16 = vpop.eup %1571  ;;  %v955_v17 = vmul.f32 1.442695, %v954_v15 }
 0x27e   : > { %v1574_v18 = vpop.eup %1573  ;;  %v1031_v19 = vsel %vm806_vm3, %v1572_v16, 0.0 }
 0x27f   : > { %v817_v20 = vmul.f32 %v1574_v18, %v1568_v63  ;;  %1575 = vpow2.f32 %v955_v17  ;;  %1032 = vadd.xlane.f32.xlu0 %v1031_v19 }
 0x281   : > { %v818_v21 = vpack.c.bf16 %v817_v20, %v817_v20 }
 0x282   : > { %v895_v22 = vpop.permute.xlu2 %894 }
 0x283   : > { %1372 = vmatmul.msk.bf16.vlgmr.msrb.gmra.mxu0 %vm806_vm3, %v818_v21  ;;  %907 = vmatpush.bf16.msrb.mxu2 %v895_v22 }
 0x285   : > { %v1576_v23 = vpop.eup %1575 }
 0x286   : > { %v957_v24 = vsel %vm806_vm3, %v1576_v23, 0.0 }
 0x287   : > { %958 = vadd.xlane.f32.xlu1 %v957_v24 }
 0x293   : > { %1042 = vrot.lane.b32.xlu0 %v1433_v25, %s1935_s20  ;;  %s1107_s20 = scalar_lea.sflag [#allocation7], %s2174_s8 }
 0x2a0   : > { %968 = vrot.lane.b32.xlu1 %v1431_v26, %s1933_s1  ;;  %s1120_s1 = sshll.u32 %s629_s11, 4  ;;  %s1121_s1 = int_to_ptr.vmem [resolvable:$true] %s1120_s1 }
 0x2e2   : > { %v885_v27 = vpop.xlane.xlu0 %884 }
 0x2e3   : > { %1577 = vrcp.f32 %v885_v27 }
 0x2e9   : > { %v1578_v28 = vpop.eup %1577 }
 0x2ea   : > { %v887_v29 = vmul.f32 %v1578_v28, %v1570_v8 }
 0x2ec   : > { %v888_v30 = vpack.c.bf16 %v887_v29, %v887_v29 }
 0x2ee   : > { %1382 = vmatmul.msk.bf16.vlgmr.msrb.gmra.mxu2 %vm806_vm3, %v888_v30 }
 0x2f2   : > { %v1033_v31 = vpop.xlane.xlu0 %1032 }
 0x2f3   : > { %1579 = vrcp.f32 %v1033_v31 }
 0x2f9   : > { %v1580_v32 = vpop.eup %1579 }
 0x2fa   : > { %v1035_v34 = vmul.f32 %v1580_v32, %v1572_v16  ;;  %v959_v35 = vpop.xlane.xlu1 %958 }
 0x2fb   : > { %1581 = vrcp.f32 %v959_v35 }
 0x2fc   : > { %v1036_v37 = vpack.c.bf16 %v1035_v34, %v1035_v34 }
 0x300   : > { %v837_v33 = vpop.f32.mrf.mxu0 }
 0x301   : > { %841 = vst.msk [vmem:[#allocation4] sm:$0xff] %vm786_vm2, %v837_v33  ;;  %v1582_v39 = vpop.eup %1581 }
 0x302   : > { %v961_v40 = vmul.f32 %v1582_v39, %v1576_v23 }
 0x304   : > { %v962_v42 = vpack.c.bf16 %v961_v40, %v961_v40 }
 0x305   : > { %v1043_v36 = vpop.permute.xlu0 %1042 }
 0x306   : > { %1055 = vmatpush.bf16.msra.mxu2 %v1043_v36 }
 0x308   : > { %v839_v38 = vpop.f32.mrf.mxu0 }
 0x309   : > { %1402 = vmatmul.msk.bf16.vlgmr.msra.gmra.mxu2 %vm806_vm3, %v1036_v37 }
 0x312   : > { %v969_v41 = vpop.permute.xlu1 %968 }
 0x313   : > { %981 = vmatpush.bf16.msra.mxu0 %v969_v41 }
 0x316   : > { %1392 = vmatmul.msk.bf16.vlgmr.msra.gmra.mxu0 %vm806_vm3, %v962_v42 }
 0x371   : > { %v909_v43 = vpop.f32.mrf.mxu2 }
 0x372   : > { %914 = vrot.lane.b32.xlu2 %v909_v43, %s1936_s0 }
 0x379   : > { %v911_v44 = vpop.f32.mrf.mxu2 }
 0x38c   : > { %v1057_v45 = vpop.f32.mrf.mxu2 }
 0x38d   : > { %1062 = vrot.lane.b32.xlu2 %v1057_v45, %s1937_s9 }
 0x393   : > { %v983_v46 = vpop.f32.mrf.mxu0 }
 0x394   : > { %v1059_v47 = vpop.f32.mrf.mxu2  ;;  %988 = vrot.lane.b32.xlu0 %v983_v46, %s1938_s30 }
 0x39b   : > { %v985_v48 = vpop.f32.mrf.mxu0 }
 0x3cc   : > { %v915_v49 = vpop.permute.xlu2 %914 }
 0x3cd   : > { %918 = vst.msk [vmem:[#allocation4] sm:$0xff] %vm917_vm4, %v915_v49 }
 0x3e7   : > { %v1063_v53 = vpop.permute.xlu2 %1062 }
 0x406   : > { %v989_v52 = vpop.permute.xlu0 %988 }
 0x407   : > { %992 = vst.msk [vmem:[#allocation4] sm:$0xff] %vm991_vm5, %v989_v52 }
 0x408   : > { %1066 = vst.msk [vmem:[#allocation4] sm:$0xff] %vm1065_vm6, %v1063_v53 }
 0x40f   : > { %v1067_v54 = vld [vmem:[#allocation4] sm:$0xff] }
 0x410   : > { %v1068_v55 = vpack.c.bf16 %v1067_v54, %v1067_v54 }
 0x412   : > { %1411 = vmatmul.msk.bf16.vlgmr.msra.gmra.mxu3 %vm662_vm0, %v1068_v55 }
 0x495   : > { %v1101_v57 = vpop.f32.mrf.mxu3 }
 0x496   : > { %v1102_v58 = vadd.f32 %v1566_v56, %v1101_v57 }
 0x498   : > { %1105 = vst.msk [vmem:[%s629_s11] sm:$0xff] %vm662_vm0, %v1102_v58 }
 0x499   : > { %1850 = shalt.err (!%p1847_p12)
}
 0x49a   : > { %1460 = dma.vmem_to_hbm [thread:$0]  (%p2093_p7), %s1121_s1, 128, %s1123_s14, %s1107_s20  }
 0x49d   : > { %v1103_v59 = vpop.f32.mrf.mxu3 }
 0x49e PF: > { %s2362_s8 = sld [smem:[#allocation27_spill]]  ;;  %p2364_p13 = scmp.ge.s32.totalorder %s1925_s26, 2 }
 0x4a0   : > { %p1489_p0 = pnand %p2364_p13, %p2049_p6 }
 0x4a2   : > { %p1490_p3 = pneg %p1489_p0 }
 0x4a4   : > { %s1134_s13 = sand.u32 1, %s2362_s8  }
 0x4a5   : > { %s1135_s16 = scalar_lea.sflag [#allocation7], %s1134_s13 }
 0x4a6   : > { %1900 = dma.done.wait (%p1490_p3), %s1135_s16, 128  }
 0x4a7   : > { %1902 = vsyncadd (%p1490_p3), %s1135_s16, 4294967168  ;;  %s36_s26 = sadd.s32 1, %s1925_s26   ;;  %s2365_s15 = sld [smem:[#allocation32_spill]] }
 0x4a8   : > { %p33_p5 = scmp.ge.s32.totalorder %s36_s26, 4   ;;  %s2366_s28 = sld [smem:[#allocation30_spill]] }
 0x4a9   : > { %s2367_s21 = smov %s1909_s22  ;;  %s2368_s22 = smov %s1913_s23 }
 0x4aa   : > { %s2370_s24 = smov %s1921_s25  ;;  %35 = sbr.rel (!%p33_p5) target bundleno = 21 (0x15), region = 170 }
 0x4ad   : > { %s2369_s23 = smov %s2365_s15 }
 0x4ae   : > { %s2371_s25 = smov %s2366_s28 }
 0x4af   :  { %1141 = vsyncpa [#allocation6], 1 }
 0x4b0   :  { %1143 = vsyncpa [#allocation6 + $0x1], 1 }
 0x4b1   :  { %1144 = vsyncpa [#allocation9], 1 }
 0x4b2   :  { %1146 = vsyncpa [#allocation9 + $0x1], 1 }
 0x4b3   :  { %1147 = vsyncpa [#allocation12], 1 }
 0x4b4   :  { %1149 = vsyncpa [#allocation12 + $0x1], 1 }
 0x4b5   :  { %1150 = vsyncpa [#allocation15], 1 }
 0x4b6   :  { %1151 = vsyncpa [#allocation18], 1 }
 0x4b7   :  { %1152 = vsyncpa [#allocation7], 1 }
 0x4b8   :  { %1154 = vsyncpa [#allocation7 + $0x1], 1 }

</bundles_post_ra>
